<compile_context>
chip_gen: v7x
topology: tpu7x:2x2x1
jax: 0.10.0
libtpu: 0.0.40
codegen_flags: <defaults>
</compile_context>

<pallas_src>
import math

import jax
import jax.numpy as jnp
from jax.experimental import pallas as pl
from jax.experimental.pallas import tpu as pltpu


# ----------------------------------------------------------------------------- helpers
def _cdiv(a, b):
    return -(-a // b)


def _round_up(v, q):
    return _cdiv(v, q) * q


def _sublane_quantum(dtype):
    # packed sublane tiling: (8,128) f32, (16,128) bf16, (32,128) int8/fp8
    return {4: 8, 2: 16, 1: 32}.get(jnp.dtype(dtype).itemsize, 8)


_BUDGET_CACHE = None


def _block_budget_bytes():
    """Per-block byte budget derived from the chip's VMEM capacity."""
    global _BUDGET_CACHE
    if _BUDGET_CACHE is None:
        budget = 2 << 20  # safe default (v7x has only 64 MiB physical VMEM)
        try:
            cap = getattr(pltpu.get_tpu_info(), "vmem_capacity_bytes", 64 << 20)
            if cap >= (100 << 20):  # v5e / v6e: 128 MiB physical VMEM
                budget = 4 << 20
        except Exception:
            pass
        _BUDGET_CACHE = budget
    return _BUDGET_CACHE


def _ensure_multi_step(R, C, tr, tl, sq):
    """If the grid collapsed to a single step, split the largest axis so both
    v7x TensorCores (megacore) get work on this purely parallel map."""
    if _cdiv(R, tr) * _cdiv(C, tl) >= 2:
        return tr, tl
    if C > 128:
        tl2 = max(128, _round_up(_cdiv(C, 2), 128))
        if _cdiv(C, tl2) >= 2:
            return tr, tl2
    if R > sq:
        tr2 = max(sq, _round_up(_cdiv(R, 2), sq))
        if _cdiv(R, tr2) >= 2:
            return tr2, tl
    return tr, tl


# ----------------------------------------------------------------------------- kernel
def _dyt_kernel(alpha_ref, x_ref, w_ref, b_ref, o_ref):
    # alpha_ref: (1,) scalar in SMEM
    # x_ref/o_ref: (tr, tl) VMEM tile; w_ref/b_ref: (1, tl) or (tr, 1) tile
    a = alpha_ref[0].astype(jnp.float32)
    x = x_ref[...].astype(jnp.float32)
    w = w_ref[...].astype(jnp.float32)
    b = b_ref[...].astype(jnp.float32)
    o_ref[...] = (jnp.tanh(a * x) * w + b).astype(o_ref.dtype)


# ----------------------------------------------------------------------------- launchers
def _run_lane_bcast(x2, w2, b2, alpha):
    """x2: (R, C); w2/b2: (1, C). Params broadcast along sublanes (rows)."""
    R, C = x2.shape
    itemsize = jnp.dtype(x2.dtype).itemsize
    sq = _sublane_quantum(x2.dtype)
    budget = _block_budget_bytes()

    lane_cap = max(128, (budget // (sq * itemsize)) // 128 * 128)
    tl = min(_round_up(C, 128), lane_cap)
    if tl >= C:
        tl = C  # full extent is always a legal block shape
    cap_rows = max(sq, (budget // (tl * itemsize)) // sq * sq)
    tr = min(_round_up(R, sq), cap_rows)
    if tr >= R:
        tr = R
    tr, tl = _ensure_multi_step(R, C, tr, tl, sq)

    n_row, n_lane = _cdiv(R, tr), _cdiv(C, tl)
    x_blk = tr * tl * itemsize
    p_blk = 8 * tl * jnp.dtype(w2.dtype).itemsize  # (1, tl) pads to 8 sublanes
    vmem_limit = int(min(4 * x_blk + 4 * p_blk + (8 << 20), 56 << 20))

    # Lane axis is the OUTER grid axis -> param block index is constant across
    # the inner row axis, so weight/bias are not re-DMAed every step.
    return pl.pallas_call(
        _dyt_kernel,
        out_shape=jax.ShapeDtypeStruct((R, C), x2.dtype),
        grid=(n_lane, n_row),
        in_specs=[
            pl.BlockSpec(memory_space=pltpu.MemorySpace.SMEM),      # alpha
            pl.BlockSpec((tr, tl), lambda j, i: (i, j)),            # x
            pl.BlockSpec((1, tl), lambda j, i: (0, j)),             # weight
            pl.BlockSpec((1, tl), lambda j, i: (0, j)),             # bias
        ],
        out_specs=pl.BlockSpec((tr, tl), lambda j, i: (i, j)),
        compiler_params=pltpu.CompilerParams(
            dimension_semantics=("parallel", "parallel"),
            vmem_limit_bytes=vmem_limit),
    )(alpha, x2, w2, b2)


def _run_row_bcast(x2, w2, b2, alpha):
    """x2: (R, C); w2/b2: (R, 1). Params broadcast along lanes (columns)."""
    R, C = x2.shape
    itemsize = jnp.dtype(x2.dtype).itemsize
    sq = _sublane_quantum(x2.dtype)
    budget = _block_budget_bytes()

    lane_cap = max(128, (budget // (sq * itemsize)) // 128 * 128)
    tl = min(_round_up(C, 128), lane_cap)
    if tl >= C:
        tl = C
    # account for the lane-padded (tr, 1) param blocks (pad to 128 lanes each)
    cap_rows = max(sq, (budget // ((tl + 2 * 128) * itemsize)) // sq * sq)
    tr = min(_round_up(R, sq), cap_rows)
    if tr >= R:
        tr = R
    tr, tl = _ensure_multi_step(R, C, tr, tl, sq)

    n_row, n_lane = _cdiv(R, tr), _cdiv(C, tl)
    x_blk = tr * tl * itemsize
    p_blk = tr * 128 * jnp.dtype(w2.dtype).itemsize  # (tr, 1) pads to 128 lanes
    vmem_limit = int(min(4 * x_blk + 8 * p_blk + (8 << 20), 56 << 20))

    # Row axis outer -> (tr, 1) param block index constant across inner lane axis.
    return pl.pallas_call(
        _dyt_kernel,
        out_shape=jax.ShapeDtypeStruct((R, C), x2.dtype),
        grid=(n_row, n_lane),
        in_specs=[
            pl.BlockSpec(memory_space=pltpu.MemorySpace.SMEM),      # alpha
            pl.BlockSpec((tr, tl), lambda i, j: (i, j)),            # x
            pl.BlockSpec((tr, 1), lambda i, j: (i, 0)),             # weight
            pl.BlockSpec((tr, 1), lambda i, j: (i, 0)),             # bias
        ],
        out_specs=pl.BlockSpec((tr, tl), lambda i, j: (i, j)),
        compiler_params=pltpu.CompilerParams(
            dimension_semantics=("parallel", "parallel"),
            vmem_limit_bytes=vmem_limit),
    )(alpha, x2, w2, b2)


def _dyt_lane(x2, w, b, alpha):
    """x2: (r, k) with the param axis last (lane-wise broadcast)."""
    r, k = x2.shape
    itemsize = jnp.dtype(x2.dtype).itemsize
    sq = _sublane_quantum(x2.dtype)
    budget = _block_budget_bytes()

    if k % 128 != 0:
        # Make the store lane-dense: flatten to (r*k/L, L), L a multiple of 128
        # and of k, params host-tiled to (1, L) (only L*itemsize bytes of HBM).
        total = r * k
        base = math.lcm(k, 128)
        lane_cap = max(128, (budget // (sq * itemsize)) // 128 * 128)
        L = 0
        if total % base == 0:
            m_max = max(1, min(lane_cap, total) // base)
            for m in range(m_max, 0, -1):
                if total % (m * base) == 0:
                    L = m * base
                    break
        if L:
            reps = L // k
            xf = x2.reshape(total // L, L)
            wf = jnp.tile(w, reps).reshape(1, L)
            bf = jnp.tile(b, reps).reshape(1, L)
            return _run_lane_bcast(xf, wf, bf, alpha).reshape(r, k)
        # No legal lane-dense flattening (odd k, odd r): fall through with a
        # cdiv grid and a masked tail tile (correct, bounded VMEM).
    return _run_lane_bcast(x2, w.reshape(1, k), b.reshape(1, k), alpha)


# ----------------------------------------------------------------------------- public API
def dynamic_tanh(x, alpha, weight, bias, *, channels_last):
    """JAX/Pallas equivalent of DynamicTanh.forward."""
    norm_shape = weight.shape
    nd = len(norm_shape)
    k = math.prod(norm_shape)
    w_flat = weight.reshape(-1)
    b_flat = bias.reshape(-1)

    if channels_last:
        lead = x.shape[: x.ndim - nd]
        r = math.prod(lead) if lead else 1
        out = _dyt_lane(x.reshape(r, k), w_flat, b_flat, alpha)
        return out.reshape(x.shape)

    # channels_first: x is (B, *norm_shape, *extra)
    b_dim = x.shape[0]
    extra = x.shape[1 + nd:]
    e = math.prod(extra) if extra else 1
    if e == 1:
        # No trailing spatial dims: a last-dim-1 layout would be 1/128 lane
        # utilization; reroute through the lane-dense path instead.
        out = _dyt_lane(x.reshape(b_dim, k), w_flat, b_flat, alpha)
        return out.reshape(x.shape)

    # (B*k, e) view: blocks span multiple batch images; params tiled per batch
    # host-side (B*k*itemsize bytes, negligible HBM).
    x2 = x.reshape(b_dim * k, e)
    w2 = jnp.tile(w_flat, b_dim).reshape(b_dim * k, 1)
    b2 = jnp.tile(b_flat, b_dim).reshape(b_dim * k, 1)
    out = _run_row_bcast(x2, w2, b2, alpha)
    return out.reshape(x.shape)


# ----------------------------------------------------------------------------- tests
if __name__ == "__main__":
    key = jax.random.PRNGKey(0)
    k1, k2, k3, k4, k5 = jax.random.split(key, 5)

    alpha = jnp.full((1,), 0.5, dtype=jnp.float32)

    # Case 1: channels_last=False, NCHW input (common celldetection usage).
    x = jax.random.normal(k1, (2, 4, 16, 16), dtype=jnp.float32)
    weight = jax.random.normal(k2, (4,), dtype=jnp.float32)
    bias = jax.random.normal(k3, (4,), dtype=jnp.float32)
    out = jax.block_until_ready(
        dynamic_tanh(x, alpha, weight, bias, channels_last=False))
    ref = jnp.tanh(alpha[0] * x) * weight[None, :, None, None] + bias[None, :, None, None]
    assert out.shape == ref.shape and out.dtype == ref.dtype
    assert bool(jnp.allclose(out, ref, atol=1e-6, rtol=1e-6))

    # Case 2: channels_last=True, (..., C) input with C=32 (< 128) -> flattened
    # lane-dense path with host-tiled params.
    x2 = jax.random.normal(k4, (2, 8, 32), dtype=jnp.float32)
    w2 = jnp.linspace(0.5, 1.5, 32, dtype=jnp.float32)
    b2 = jnp.linspace(-0.25, 0.25, 32, dtype=jnp.float32)
    out2 = jax.block_until_ready(
        dynamic_tanh(x2, alpha, w2, b2, channels_last=True))
    ref2 = jnp.tanh(alpha[0] * x2) * w2 + b2
    assert out2.shape == ref2.shape and out2.dtype == ref2.dtype
    assert bool(jnp.allclose(out2, ref2, atol=1e-6, rtol=1e-6))

    # Case 3: channels_last=False with no trailing spatial dims -> rerouted
    # through the lane-dense path.
    x3 = jax.random.normal(k5, (2, 32), dtype=jnp.float32)
    out3 = jax.block_until_ready(
        dynamic_tanh(x3, alpha, w2, b2, channels_last=False))
    ref3 = jnp.tanh(alpha[0] * x3) * w2 + b2
    assert out3.shape == ref3.shape and out3.dtype == ref3.dtype
    assert bool(jnp.allclose(out3, ref3, atol=1e-6, rtol=1e-6))

    print("KERNEL_OK")
</pallas_src>

<mosaic_0001>
module attributes {stable_mosaic.version = 11 : i64} {
  func.func @_dyt_kernel(%arg0: i32, %arg1: i32, %arg2: memref<1xf32, #tpu.memory_space<smem>>, %arg3: memref<8x128xf32, #tpu.memory_space<vmem>>, %arg4: memref<8x1xf32, #tpu.memory_space<vmem>>, %arg5: memref<8x1xf32, #tpu.memory_space<vmem>>, %arg6: memref<8x128xf32, #tpu.memory_space<vmem>>) attributes {dimension_semantics = [#tpu.dimension_semantics<parallel>, #tpu.dimension_semantics<parallel>], iteration_bounds = array<i64: 1, 2>, scalar_prefetch = 0 : i64, scratch_operands = 0 : i64, tpu.core_type = #tpu.core_type<tc>, window_params = [{transform_indices = @transform_0, window_bounds = array<i64: 1>}, {transform_indices = @transform_1, window_bounds = array<i64: 8, 128>}, {transform_indices = @transform_2, window_bounds = array<i64: 8, 1>}, {transform_indices = @transform_3, window_bounds = array<i64: 8, 1>}, {transform_indices = @transform_4, window_bounds = array<i64: 8, 128>}]} {
    %c0 = arith.constant 0 : index
    %0 = memref.load %arg2[%c0] : memref<1xf32, #tpu.memory_space<smem>>
    %c0_0 = arith.constant 0 : index
    %c0_1 = arith.constant 0 : index
    %1 = vector.load %arg3[%c0_0, %c0_1] : memref<8x128xf32, #tpu.memory_space<vmem>>, vector<8x128xf32>
    %c0_2 = arith.constant 0 : index
    %c0_3 = arith.constant 0 : index
    %2 = vector.load %arg4[%c0_2, %c0_3] : memref<8x1xf32, #tpu.memory_space<vmem>>, vector<8x1xf32>
    %c0_4 = arith.constant 0 : index
    %c0_5 = arith.constant 0 : index
    %3 = vector.load %arg5[%c0_4, %c0_5] : memref<8x1xf32, #tpu.memory_space<vmem>>, vector<8x1xf32>
    %4 = vector.broadcast %0 : f32 to vector<8x128xf32>
    %5 = arith.mulf %4, %1 : vector<8x128xf32>
    %6 = math.tanh %5 : vector<8x128xf32>
    %7 = vector.broadcast %2 : vector<8x1xf32> to vector<8x128xf32>
    %8 = arith.mulf %6, %7 : vector<8x128xf32>
    %9 = vector.broadcast %3 : vector<8x1xf32> to vector<8x128xf32>
    %10 = arith.addf %8, %9 : vector<8x128xf32>
    %c0_6 = arith.constant 0 : index
    %c0_7 = arith.constant 0 : index
    %11 = vector.load %arg6[%c0_6, %c0_7] : memref<8x128xf32, #tpu.memory_space<vmem>>, vector<8x128xf32>
    tpu.vector_store %arg6[%c0_6, %c0_7], %10 {strides = array<i32>} : memref<8x128xf32, #tpu.memory_space<vmem>>, vector<8x128xf32>,
    return
  }
  func.func @transform_0(%arg0: i32, %arg1: i32) -> i32 {
    %c0_i32 = arith.constant 0 : i32
    %c0_i32_0 = arith.constant 0 : i32
    return %c0_i32 : i32
  }
  func.func @transform_1(%arg0: i32, %arg1: i32) -> (i32, i32) {
    %c0_i32 = arith.constant 0 : i32
    return %arg0, %arg1 : i32, i32
  }
  func.func @transform_2(%arg0: i32, %arg1: i32) -> (i32, i32) {
    %c0_i32 = arith.constant 0 : i32
    %c0_i32_0 = arith.constant 0 : i32
    return %arg0, %c0_i32 : i32, i32
  }
  func.func @transform_3(%arg0: i32, %arg1: i32) -> (i32, i32) {
    %c0_i32 = arith.constant 0 : i32
    %c0_i32_0 = arith.constant 0 : i32
    return %arg0, %c0_i32 : i32, i32
  }
  func.func @transform_4(%arg0: i32, %arg1: i32) -> (i32, i32) {
    %c0_i32 = arith.constant 0 : i32
    return %arg0, %arg1 : i32, i32
  }
}

</mosaic_0001>

<bundles_post_ra>
// kernel: tpu_custom_call.1
= control target key start
LH: loop header
LB: loop body
LE: loop exit
PB: predicated region body
PF: predicated region fallthrough
CT: control target
= control target key end

     0   :  { %s697_s0 = inlined_call_operand.<no memory space> [shape: f32[1], index: 0, kind: input, shape index: {}]   ;;  %s698_s1 = inlined_call_operand.vmem [shape: f32[8,256], index: 1, kind: input, shape index: {}]   ;;  %s699_s2 = inlined_call_operand.vmem [shape: f32[8,1], index: 2, kind: input, shape index: {}]   ;;  %s700_s3 = inlined_call_operand.vmem [shape: f32[8,1], index: 3, kind: input, shape index: {}]   ;;  %s701_s4 = inlined_call_operand.hbm [shape: f32[8,256], index: 4, kind: output, shape index: {}]  }
   0x1   :  { %9 = sst [smem:[#allocation2]] %s697_s0 }
   0x2   :  { %10 = vsyncpa [#allocation4], 0 }
   0x3   :  { %12 = vsyncpa [#allocation4 + $0x1], 0  ;;  %s579_s17 = smov 0   ;;  %s581_s18 = smov 0  }
   0x4   :  { %s583_s19 = smov 0   ;;  %s585_s20 = smov 0  }
   0x5   :  { %s587_s21 = smov 0   ;;  %s589_s22 = smov 0  }
   0x6 LB: > { %s397_s0 = sadd.s32 4294967295, %s547_s22   ;;  %s398_s23 = sadd.s32 4294967294, %s547_s22   ;;  %s547_s22 = sphi %s589_s22, %s18_s22   ;;  %s543_s21 = sphi %s587_s21, %s708_s21   ;;  %s539_s20 = sphi %s585_s20, %s707_s20   ;;  %s535_s19 = sphi %s583_s19, %s706_s19   ;;  %s531_s18 = sphi %s581_s18, %s705_s18   ;;  %s527_s17 = sphi %s579_s17, %s704_s17  }
   0x7   : > { %s27_s24 = sadd.s32 1, %s543_s21  ;;  %s140_s25 = sadd.s32 1, %s535_s19 }
   0x8   : > { %p28_p0 = scmp.ge.s32.totalorder %s27_s24, 2  ;;  %p150_p1 = scmp.ne.s32.totalorder %s535_s19, %s531_s18 }
   0x9   : > { %p151_p2 = scmp.eq.s32.totalorder %s397_s0, 1  ;;  %p156_p3 = scmp.ne.s32.totalorder %s531_s18, %s527_s17 }
   0xa   : > { %s710_s24 = smov (%p28_p0, %s27_s24), 0  ;;  %p157_p5 = scmp.eq.s32.totalorder %s398_s23, 1 }
   0xb   : > { %p619_p4 = por %p151_p2, %p150_p1  ;;  %s136_s27 = ssub.s32 %s543_s21, %s710_s24 }
   0xc   : > { %p403_p6 = scmp.ge.s32.totalorder %s547_s22, 1  ;;  %p138_p7 = scmp.eq.s32.totalorder %s136_s27, 0 }
   0xd   : > { %p626_p8 = por %p157_p5, %p156_p3  ;;  %p203_p9 = scmp.lt.s32.totalorder %s547_s22, 3 }
   0xe   : > { %s632_s29 = scalar_select %p138_p7, %s535_s19, %s140_s25  }
   0xf   : > { %p204_p10 = pnand %p403_p6, %p203_p9 }
  0x10   : > { %v258_v0 = vld [vmem:[%s699_s2] sm:$0xff] (!%p204_p10)  ;;  %v549_v1 = vmov (!%p204_p10), 0   ;;  %p242_p11 = scmp.lt.s32.totalorder (!%p204_p10), %s539_s20, 1  ;;  %s256_s9 = sld [smem:[#allocation2]] (!%p204_p10) }
  0x11   : > { %207 = sbr.rel (%p204_p10) target bundleno = 166 (0xa6), region = 36  ;;  %466 = vset.pattern.permute.xlu0 (!%p204_p10), %v549_v1  ;;  %v259_v2 = vld [vmem:[%s700_s3] sm:$0xff] (!%p204_p10)  ;;  %s237_s14 = sand.u32 (!%p204_p10), 1, %s531_s18  }
  0x12   : > { %265 = vperm.xlu0 (!%p204_p10), %466, %v258_v0   ;;  %s404_s15 = sshll.u32 (!%p204_p10), %s237_s14, 3  ;;  %s407_s16 = sshll.u32 (!%p204_p10), %s539_s20, 7 }
  0x13   : > { %s239_s0 = scalar_lea.vmem (!%p204_p10), [#allocation3], %s404_s15  ;;  %s650_s30 = scalar_lea.hbm (!%p204_p10), %s701_s4, %s407_s16 }
  0x14   : > { %s292_s23 = sshll.u32 (!%p204_p10), %s239_s0, 4  ;;  %s277_s5 = scalar_lea.sflag (!%p204_p10), [#allocation4], %s237_s14  ;;  %s652_s23 = int_to_ptr.vmem [resolvable:$true] %s292_s23 }
  0x15   : > { %s469_s6 = scalar_lea.vmem (!%p204_p10), %s652_s23, 128 }
  0x16   : > { %271 = vperm.xlu0 (!%p204_p10), %466, %v259_v2   ;;  %v260_v4 = vstv (!%p204_p10), %s256_s9  ;;  %p470_p12 = scmp.ne.s32.totalorder (!%p204_p10), %s652_s23, %s469_s6 }
  0x18   : > { %s243_s8 = scalar_select %p242_p11, %s539_s20, 1 }
  0x19   : > { %p471_p13 = pnand %p470_p12, %p619_p4  ;;  %s550_s20 = smov [#allocation3]  }
  0x1a   : > { %s405_s10 = sshll.u32 %s243_s8, 3  ;;  %s473_s7 = sshll.u32 %s550_s20, 4  ;;  %s474_s7 = int_to_ptr.vmem [resolvable:$false] %s473_s7 }
  0x1b   : > { %s247_s13 = scalar_lea.vmem %s698_s1, %s405_s10  ;;  %p472_p0 = pneg %p471_p13 }
  0x1c   : > { %v257_v3 = vld [vmem:[%s247_s13] sm:$0xff]  ;;  %s475_s8 = scalar_lea.vmem %s474_s7, 256  ;;  %p476_p1 = scmp.lt.s32.totalorder %s652_s23, %s474_s7 }
  0x1d   : > { %v261_v5 = vmul.f32 %v260_v4, %v257_v3  ;;  %p477_p2 = scmp.lt.s32.totalorder %s475_s8, %s469_s6 }
  0x1f   : > { %467 = vtanh.f32 %v261_v5  ;;  %p478_p3 = por %p477_p2, %p476_p1 }
  0x21   : > { %p479_p5 = pnand %p478_p3, %p472_p0 }
  0x29   : > { %v468_v6 = vpop.eup %467 }
  0x91   : > { %v266_v7 = vpop.permute.xlu0 %265 }
  0x92   : > { %v268_v8 = vmul.f32 %v468_v6, %v266_v7 }
  0x95   : > { %v272_v9 = vpop.permute.xlu0 %271 }
  0x96   : > { %v274_v10 = vadd.f32 %v272_v9, %v268_v8 }
  0x98   : > { %275 = vst [vmem:[%s239_s0] sm:$0xff] %v274_v10 }
  0x99   : > { %482 = shalt.err (!%p479_p5)
}
  0x9a   : > { %s483_s9 = scalar_lea.hbm %s650_s30, 128  ;;  %s487_s12 = scalar_lea.hbm %s701_s4, 256 }
  0x9b   : > { %p484_p6 = scmp.ne.s32.totalorder %s650_s30, %s483_s9  ;;  %p488_p10 = scmp.lt.u32.totalorder %s650_s30, %s701_s4 }
  0x9c   : > { %p489_p11 = scmp.lt.u32.totalorder %s487_s12, %s483_s9  ;;  %p491_p13 = scmp.lt.u32.totalorder %s483_s9, %s650_s30 }
  0x9d   : > { %p485_p7 = pnand %p484_p6, %p619_p4 }
  0x9e   : > { %p490_p12 = por %p489_p11, %p488_p10 }
  0x9f   : > { %p486_p9 = pneg %p485_p7 }
  0xa0   : > { %p492_p0 = por %p491_p13, %p490_p12 }
  0xa2   : > { %p493_p1 = pnand %p492_p0, %p486_p9 }
  0xa4   : > { %496 = shalt.err (!%p493_p1)
}
  0xa5   : > { %410 = dma.vmem_to_hbm [thread:$0]  (%p619_p4), %s652_s23, 128, %s650_s30, %s277_s5  }
  0xa6 PF: > { %p416_p2 = scmp.ge.s32.totalorder %s547_s22, 2  ;;  %s304_s15 = sand.u32 1, %s527_s17  }
  0xa7   : > { %s305_s16 = scalar_lea.sflag [#allocation4], %s304_s15 }
  0xa8   : > { %p413_p3 = pnand %p416_p2, %p626_p8 }
  0xaa   : > { %522 = dma.done.wait (!%p413_p3), %s305_s16, 128  }
  0xab   : > { %524 = vsyncadd (!%p413_p3), %s305_s16, 4294967168  ;;  %s18_s22 = sadd.s32 1, %s547_s22   ;;  %s704_s17 = smov %s531_s18 }
  0xac   : > { %p15_p5 = scmp.ge.s32.totalorder %s18_s22, 4   ;;  %s705_s18 = smov %s535_s19 }
  0xad   : > { %s706_s19 = smov %s632_s29  ;;  %s707_s20 = smov %s543_s21 }
  0xae   : > { %s708_s21 = smov %s710_s24  ;;  %17 = sbr.rel (!%p15_p5) target bundleno = 6 (0x6), region = 77 }
  0xb5   :  { %310 = vsyncpa [#allocation4], 1 }
  0xb6   :  { %312 = vsyncpa [#allocation4 + $0x1], 1 }

</bundles_post_ra>
